<compile_context>
chip_gen: v7x
topology: tpu7x:2x2x1
jax: 0.10.0
libtpu: 0.0.40
codegen_flags: <defaults>
</compile_context>

<pallas_src>
import functools

import jax
import jax.numpy as jnp
from jax.experimental import pallas as pl
from jax.experimental.pallas import tpu as pltpu


def _region_stats_kernel(x_ref, y_ref, out_ref, *, rh_per_tile, hh, ww):
    """One (H-tile, batch-element) grid step.

    x_ref  : (1, C, tH, W) logits block (native dtype, cast to f32 in-kernel)
    y_ref  : (1, 1, tH, W) int32 labels block
    out_ref: (rh_per_tile, 3, C, Rw) f32 region-pooled [tp, softmax, one-hot],
             accumulated over the batch grid axis (batch_dice sum).
    """
    _, C, tH, W = x_ref.shape
    Rw = out_ref.shape[-1]
    b = pl.program_id(1)

    @pl.when(b == 0)
    def _init():
        out_ref[...] = jnp.zeros_like(out_ref)

    xb = x_ref[0].astype(jnp.float32)                  # (C, tH, W)

    # Numerically stable softmax over channels; exp / reciprocal on the EUP.
    m = jnp.max(xb, axis=0, keepdims=True)
    e = jnp.exp(xb - m)
    s = jnp.sum(e, axis=0, keepdims=True)
    inv = pl.reciprocal(s, approx=True)                # EUP slot
    inv = inv * (2.0 - s * inv)                        # one Newton step -> ~f32 exact
    sm = e * inv                                       # softmax, (C, tH, W)

    # One-hot mask from labels; tp / one-hot via vsel (no convert + multiply).
    cls = jax.lax.broadcasted_iota(jnp.int32, (C, tH, W), 0)
    mask = cls == y_ref[0]                             # (C, tH, W) vs (1, tH, W)
    tp = jnp.where(mask, sm, 0.0)
    oh = jnp.where(mask, 1.0, 0.0)

    # W-axis adaptive pooling matrix built in-kernel: pw[w, r] = 1/(hh*ww) if
    # column w belongs to W-region r.  The full 1/(hh*ww) average is baked in,
    # so the later H row-sums directly yield AdaptiveAvgPool2d means.
    wi = jax.lax.broadcasted_iota(jnp.int32, (W, Rw), 0)
    lo = jax.lax.broadcasted_iota(jnp.int32, (W, Rw), 1) * ww
    pw = jnp.where((wi >= lo) & (wi < lo + ww), 1.0 / (hh * ww), 0.0)

    # Fused W-pooling of all three statistics as ONE large-M MXU contraction.
    stacked = jnp.concatenate([tp, sm, oh], axis=0).reshape(3 * C * tH, W)
    pooled = jnp.dot(stacked, pw, preferred_element_type=jnp.float32)
    pooled = pooled.reshape(3 * C, tH, Rw)

    # H-axis pooling: the tile covers `rh_per_tile` whole H-regions of hh rows,
    # so every region is a grouped row sum of the (already tiny) pooled array.
    parts = [jnp.sum(pooled[:, r * hh:(r + 1) * hh, :], axis=1)   # (3*C, Rw)
             for r in range(rh_per_tile)]
    hp = jnp.stack(parts, axis=0).reshape(rh_per_tile, 3, C, Rw)

    # Single coalesced read-modify-write of the VMEM-resident output block.
    out_ref[...] += hp


def adaptive_region_tversky_loss(x, y, num_region_per_axis=(4, 4),
                                 smooth=1e-5, A=0.3, B=0.4,
                                 max_block_bytes=None, min_parallel_steps=4):
    """x: (B, C, H, W) logits (NCHW, any float dtype), y: (B, H, W) int labels.
    Module defaults: do_bg=True, batch_dice=True, 2D pooling."""
    Bn, C, H, W = x.shape
    Rh, Rw = num_region_per_axis
    assert H % Rh == 0 and W % Rw == 0, \
        "spatial dims must be divisible by region counts"
    hh, ww = H // Rh, W // Rw

    # ---- generation-aware VMEM budget ---------------------------------------
    try:
        vmem_cap = int(pltpu.get_tpu_info().vmem_capacity_bytes)
    except Exception:
        vmem_cap = 64 * 1024 * 1024            # conservative (v7x per-core VMEM)
    vmem_limit = (vmem_cap * 3) // 4           # ~96 MiB v5e/v6e, ~48 MiB v7x
    if max_block_bytes is None:
        # 2x double-buffered x/y blocks + ~7 channel-tile softmax/one-hot
        # temporaries + the lane-padded pooled scratch must fit under the limit.
        max_block_bytes = max(vmem_limit // 12, 1 << 20)

    # ---- tile selection: whole H-regions per grid step ----------------------
    bytes_per_row = C * W * x.dtype.itemsize   # one (C, row, W) slab of x
    divisors = [d for d in range(1, Rh + 1) if Rh % d == 0]
    # Mosaic blocking: tile row count must be sublane-aligned (x8) or full H.
    valid = [d for d in divisors if ((d * hh) % 8 == 0) or (d == Rh)]
    fits = [d for d in valid if d * hh * bytes_per_row <= max_block_bytes]
    if not fits:
        # Even the smallest legal H-tile exceeds the budget: take it anyway.
        # TODO(synk): add a W-region grid axis for very large C*W*hh slabs.
        fits = [min(valid)]
    want_steps = min(Rh, max(1, min_parallel_steps))
    stepped = [d for d in fits if (Rh // d) >= want_steps]
    # Largest block that still leaves >= want_steps parallel steps; otherwise
    # the smallest fitting block (maximises parallel steps for v7x megacore).
    rh_per_tile = max(stepped) if stepped else min(fits)
    tH = rh_per_tile * hh
    n_tiles = Rh // rh_per_tile

    y4 = y.reshape(Bn, 1, H, W).astype(jnp.int32)

    kernel = functools.partial(_region_stats_kernel,
                               rh_per_tile=rh_per_tile, hh=hh, ww=ww)

    cost = pl.CostEstimate(
        flops=2 * 3 * Bn * C * H * W * Rw + 12 * Bn * C * H * W,
        transcendentals=Bn * C * H * W + Bn * H * W,
        bytes_accessed=(x.size * x.dtype.itemsize + Bn * H * W * 4
                        + 3 * C * Rh * Rw * 4),
    )

    stats = pl.pallas_call(
        kernel,
        out_shape=jax.ShapeDtypeStruct((Rh, 3, C, Rw), jnp.float32),
        grid=(n_tiles, Bn),
        in_specs=[
            pl.BlockSpec((1, C, tH, W), lambda i, b: (b, 0, i, 0)),
            pl.BlockSpec((1, 1, tH, W), lambda i, b: (b, 0, i, 0)),
        ],
        out_specs=pl.BlockSpec((rh_per_tile, 3, C, Rw),
                               lambda i, b: (i, 0, 0, 0)),
        compiler_params=pltpu.CompilerParams(
            dimension_semantics=("parallel", "arbitrary"),
            vmem_limit_bytes=vmem_limit),
        cost_estimate=cost,
    )(x, y4)

    # ---- tiny Tversky epilogue on (Rh, C, Rw) region stats (plain XLA) -------
    region_tp = stats[:, 0]                    # pooled(softmax * onehot), batch-summed
    region_sm = stats[:, 1]                    # pooled(softmax)
    region_oh = stats[:, 2]                    # pooled(onehot)
    region_fp = region_sm - region_tp          # pooled(softmax * (1 - onehot))
    region_fn = region_oh - region_tp          # pooled((1 - softmax) * onehot)

    denom = region_fp + region_fn + smooth
    alpha = A + B * (region_fp + smooth) / denom
    beta = A + B * (region_fn + smooth) / denom
    tversky = (region_tp + smooth) / (
        region_tp + alpha * region_fp + beta * region_fn + smooth)
    tversky = 1.0 - tversky                    # (Rh, C, Rw)
    # batch_dice=True: sum over regions per channel, then mean over channels.
    return tversky.sum(axis=(0, 2)).mean()


def _reference_loss(x, y, num_region_per_axis=(4, 4), smooth=1e-5, A=0.3, B=0.4):
    """Pure-JAX reference mirroring the PyTorch forward (2D, do_bg, batch_dice)."""
    Bn, C, H, W = x.shape
    Rh, Rw = num_region_per_axis
    sm = jax.nn.softmax(x.astype(jnp.float32), axis=1)
    onehot = jax.nn.one_hot(y, C, axis=1, dtype=jnp.float32)      # (B, C, H, W)
    tp = sm * onehot
    fp = sm * (1 - onehot)
    fn = (1 - sm) * onehot

    def pool(t):  # AdaptiveAvgPool2d with divisible sizes
        return t.reshape(Bn, C, Rh, H // Rh, Rw, W // Rw).mean(axis=(3, 5))

    rtp, rfp, rfn = pool(tp).sum(0), pool(fp).sum(0), pool(fn).sum(0)
    alpha = A + B * (rfp + smooth) / (rfp + rfn + smooth)
    beta = A + B * (rfn + smooth) / (rfp + rfn + smooth)
    tv = (rtp + smooth) / (rtp + alpha * rfp + beta * rfn + smooth)
    tv = 1 - tv
    return tv.sum(axis=(1, 2)).mean()


if __name__ == "__main__":
    key = jax.random.PRNGKey(0)
    kx, ky = jax.random.split(key)
    Bn, C, H, W = 2, 4, 16, 16
    x = jax.random.normal(kx, (Bn, C, H, W), dtype=jnp.float32)
    y = jax.random.randint(ky, (Bn, H, W), 0, C, dtype=jnp.int32)

    # Rh=4, hh=4 -> sublane-aligned tiles force rh_per_tile=2: grid=(2, 2),
    # exercising both the parallel H-tile axis and the batch accumulation axis.
    loss = adaptive_region_tversky_loss(x, y, num_region_per_axis=(4, 4))
    loss = jax.block_until_ready(loss)

    ref = _reference_loss(x, y, num_region_per_axis=(4, 4))
    assert jnp.allclose(loss, ref, rtol=1e-4, atol=1e-5), (loss, ref)

    print("KERNEL_OK")
</pallas_src>

<mosaic_0001>
module attributes {stable_mosaic.version = 11 : i64} {
  func.func @_region_stats_kernel(%arg0: i32, %arg1: i32, %arg2: memref<1x4x8x16xf32, #tpu.memory_space<vmem>>, %arg3: memref<1x1x8x16xi32, #tpu.memory_space<vmem>>, %arg4: memref<2x3x4x4xf32, #tpu.memory_space<vmem>>) attributes {dimension_semantics = [#tpu.dimension_semantics<parallel>, #tpu.dimension_semantics<arbitrary>], iteration_bounds = array<i64: 2, 2>, scalar_prefetch = 0 : i64, scratch_operands = 0 : i64, tpu.core_type = #tpu.core_type<tc>, window_params = [{transform_indices = @transform_0, window_bounds = array<i64: 1, 4, 8, 16>}, {transform_indices = @transform_1, window_bounds = array<i64: 1, 1, 8, 16>}, {transform_indices = @transform_2, window_bounds = array<i64: 2, 3, 4, 4>}]} {
    %c0_i32 = arith.constant 0 : i32
    %0 = arith.cmpi eq, %arg1, %c0_i32 : i32
    %1 = arith.extui %0 : i1 to i32
    %c0_i32_0 = arith.constant 0 : i32
    %2 = arith.cmpi ne, %1, %c0_i32_0 : i32
    scf.if %2 {
      %cst_27 = arith.constant 0.000000e+00 : f32
      %56 = vector.broadcast %cst_27 : f32 to vector<2x3x4x4xf32>
      %c0_28 = arith.constant 0 : index
      %c0_29 = arith.constant 0 : index
      %c0_30 = arith.constant 0 : index
      %c0_31 = arith.constant 0 : index
      %57 = vector.load %arg4[%c0_28, %c0_29, %c0_30, %c0_31] : memref<2x3x4x4xf32, #tpu.memory_space<vmem>>, vector<2x3x4x4xf32>
      tpu.vector_store %arg4[%c0_28, %c0_29, %c0_30, %c0_31], %56 {strides = array<i32>} : memref<2x3x4x4xf32, #tpu.memory_space<vmem>>, vector<2x3x4x4xf32>,
    } else {
    }
    %c0 = arith.constant 0 : index
    %c0_1 = arith.constant 0 : index
    %c0_2 = arith.constant 0 : index
    %c0_3 = arith.constant 0 : index
    %3 = vector.load %arg2[%c0, %c0_1, %c0_2, %c0_3] : memref<1x4x8x16xf32, #tpu.memory_space<vmem>>, vector<1x4x8x16xf32>
    %4 = vector.shape_cast %3 : vector<1x4x8x16xf32> to vector<4x8x16xf32>
    %cst = arith.constant dense<0xFF800000> : vector<8x16xf32>
    %5 = vector.multi_reduction <maximumf>, %4, %cst [0] : vector<4x8x16xf32> to vector<8x16xf32>
    %6 = vector.shape_cast %5 : vector<8x16xf32> to vector<1x8x16xf32>
    %7 = vector.broadcast %6 : vector<1x8x16xf32> to vector<4x8x16xf32>
    %8 = arith.subf %4, %7 : vector<4x8x16xf32>
    %9 = math.exp %8 : vector<4x8x16xf32>
    %cst_4 = arith.constant dense<0.000000e+00> : vector<8x16xf32>
    %10 = vector.multi_reduction <add>, %9, %cst_4 [0] : vector<4x8x16xf32> to vector<8x16xf32>
    %11 = vector.shape_cast %10 : vector<8x16xf32> to vector<1x8x16xf32>
    %12 = tpu.reciprocal %11 {approx = true} : vector<1x8x16xf32> -> vector<1x8x16xf32>
    %13 = arith.mulf %11, %12 : vector<1x8x16xf32>
    %cst_5 = arith.constant 2.000000e+00 : f32
    %14 = vector.broadcast %cst_5 : f32 to vector<1x8x16xf32>
    %15 = arith.subf %14, %13 : vector<1x8x16xf32>
    %16 = arith.mulf %12, %15 : vector<1x8x16xf32>
    %17 = vector.broadcast %16 : vector<1x8x16xf32> to vector<4x8x16xf32>
    %18 = arith.mulf %9, %17 : vector<4x8x16xf32>
    %19 = tpu.iota {dimensions = array<i32: 0>} : vector<4x8x16xi32>
    %c0_6 = arith.constant 0 : index
    %c0_7 = arith.constant 0 : index
    %c0_8 = arith.constant 0 : index
    %c0_9 = arith.constant 0 : index
    %20 = vector.load %arg3[%c0_6, %c0_7, %c0_8, %c0_9] : memref<1x1x8x16xi32, #tpu.memory_space<vmem>>, vector<1x1x8x16xi32>
    %21 = vector.shape_cast %20 : vector<1x1x8x16xi32> to vector<1x8x16xi32>
    %22 = vector.broadcast %21 : vector<1x8x16xi32> to vector<4x8x16xi32>
    %23 = arith.cmpi eq, %19, %22 : vector<4x8x16xi32>
    %cst_10 = arith.constant 0.000000e+00 : f32
    %24 = vector.broadcast %cst_10 : f32 to vector<4x8x16xf32>
    %25 = arith.select %23, %18, %24 : vector<4x8x16xi1>, vector<4x8x16xf32>
    %cst_11 = arith.constant 1.000000e+00 : f32
    %cst_12 = arith.constant 0.000000e+00 : f32
    %26 = vector.broadcast %cst_11 : f32 to vector<4x8x16xf32>
    %27 = vector.broadcast %cst_12 : f32 to vector<4x8x16xf32>
    %28 = arith.select %23, %26, %27 : vector<4x8x16xi1>, vector<4x8x16xf32>
    %29 = tpu.iota {dimensions = array<i32: 0>} : vector<16x4xi32>
    %30 = tpu.iota {dimensions = array<i32: 1>} : vector<16x4xi32>
    %c4_i32 = arith.constant 4 : i32
    %31 = vector.broadcast %c4_i32 : i32 to vector<16x4xi32>
    %32 = arith.muli %30, %31 : vector<16x4xi32>
    %33 = arith.cmpi sge, %29, %32 : vector<16x4xi32>
    %c4_i32_13 = arith.constant 4 : i32
    %34 = vector.broadcast %c4_i32_13 : i32 to vector<16x4xi32>
    %35 = arith.addi %32, %34 : vector<16x4xi32>
    %36 = arith.cmpi slt, %29, %35 : vector<16x4xi32>
    %37 = arith.andi %33, %36 : vector<16x4xi1>
    %cst_14 = arith.constant 6.250000e-02 : f32
    %cst_15 = arith.constant 0.000000e+00 : f32
    %38 = vector.broadcast %cst_14 : f32 to vector<16x4xf32>
    %39 = vector.broadcast %cst_15 : f32 to vector<16x4xf32>
    %40 = arith.select %37, %38, %39 : vector<16x4xi1>, vector<16x4xf32>
    %41 = tpu.concatenate %25, %18, %28 in 0 : vector<4x8x16xf32>, vector<4x8x16xf32>, vector<4x8x16xf32> -> vector<12x8x16xf32>
    %42 = vector.shape_cast %41 : vector<12x8x16xf32> to vector<96x16xf32>
    %cst_16 = arith.constant dense<0.000000e+00> : vector<96x4xf32>
    %43 = tpu.matmul %42, %40, %cst_16 {dimension_numbers = #tpu.dot_dimension_numbers<[1], [0], [0], [1], [0, 0, 1, 1], [], []>} : vector<96x16xf32>, vector<16x4xf32>, vector<96x4xf32> -> vector<96x4xf32>
    %44 = vector.shape_cast %43 : vector<96x4xf32> to vector<12x8x4xf32>
    %45 = vector.extract_strided_slice %44 {offsets = [0, 0, 0], sizes = [12, 4, 4], strides = [1, 1, 1]} : vector<12x8x4xf32> to vector<12x4x4xf32>
    %cst_17 = arith.constant dense<0.000000e+00> : vector<12x4xf32>
    %46 = vector.multi_reduction <add>, %45, %cst_17 [1] : vector<12x4x4xf32> to vector<12x4xf32>
    %47 = vector.extract_strided_slice %44 {offsets = [0, 4, 0], sizes = [12, 4, 4], strides = [1, 1, 1]} : vector<12x8x4xf32> to vector<12x4x4xf32>
    %cst_18 = arith.constant dense<0.000000e+00> : vector<12x4xf32>
    %48 = vector.multi_reduction <add>, %47, %cst_18 [1] : vector<12x4x4xf32> to vector<12x4xf32>
    %49 = vector.shape_cast %46 : vector<12x4xf32> to vector<1x12x4xf32>
    %50 = vector.shape_cast %48 : vector<12x4xf32> to vector<1x12x4xf32>
    %51 = tpu.concatenate %49, %50 in 0 : vector<1x12x4xf32>, vector<1x12x4xf32> -> vector<2x12x4xf32>
    %52 = vector.shape_cast %51 : vector<2x12x4xf32> to vector<2x3x4x4xf32>
    %c0_19 = arith.constant 0 : index
    %c0_20 = arith.constant 0 : index
    %c0_21 = arith.constant 0 : index
    %c0_22 = arith.constant 0 : index
    %53 = vector.load %arg4[%c0_19, %c0_20, %c0_21, %c0_22] : memref<2x3x4x4xf32, #tpu.memory_space<vmem>>, vector<2x3x4x4xf32>
    %54 = arith.addf %53, %52 : vector<2x3x4x4xf32>
    %c0_23 = arith.constant 0 : index
    %c0_24 = arith.constant 0 : index
    %c0_25 = arith.constant 0 : index
    %c0_26 = arith.constant 0 : index
    %55 = vector.load %arg4[%c0_23, %c0_24, %c0_25, %c0_26] : memref<2x3x4x4xf32, #tpu.memory_space<vmem>>, vector<2x3x4x4xf32>
    tpu.vector_store %arg4[%c0_23, %c0_24, %c0_25, %c0_26], %54 {strides = array<i32>} : memref<2x3x4x4xf32, #tpu.memory_space<vmem>>, vector<2x3x4x4xf32>,
    return
  }
  func.func @transform_0(%arg0: i32, %arg1: i32) -> (i32, i32, i32, i32) {
    %c0_i32 = arith.constant 0 : i32
    %c0_i32_0 = arith.constant 0 : i32
    %c0_i32_1 = arith.constant 0 : i32
    return %arg1, %c0_i32, %arg0, %c0_i32_0 : i32, i32, i32, i32
  }
  func.func @transform_1(%arg0: i32, %arg1: i32) -> (i32, i32, i32, i32) {
    %c0_i32 = arith.constant 0 : i32
    %c0_i32_0 = arith.constant 0 : i32
    %c0_i32_1 = arith.constant 0 : i32
    return %arg1, %c0_i32, %arg0, %c0_i32_0 : i32, i32, i32, i32
  }
  func.func @transform_2(%arg0: i32, %arg1: i32) -> (i32, i32, i32, i32) {
    %c0_i32 = arith.constant 0 : i32
    %c0_i32_0 = arith.constant 0 : i32
    %c0_i32_1 = arith.constant 0 : i32
    %c0_i32_2 = arith.constant 0 : i32
    return %arg0, %c0_i32, %c0_i32_0, %c0_i32_1 : i32, i32, i32, i32
  }
}

</mosaic_0001>

<bundles_post_ra>
// kernel: tpu_custom_call.1
= control target key start
LH: loop header
LB: loop body
LE: loop exit
PB: predicated region body
PF: predicated region fallthrough
CT: control target
= control target key end

     0   :  { %s1715_s0 = inlined_call_operand.hbm [shape: f32[2,4,16,16], index: 0, kind: input, shape index: {}]   ;;  %s1716_s1 = inlined_call_operand.hbm [shape: s32[2,1,16,16], index: 1, kind: input, shape index: {}]   ;;  %s1717_s2 = inlined_call_operand.hbm [shape: f32[4,3,4,4], index: 2, kind: output, shape index: {}]  }
   0x1   :  { %1725 = sst [smem:[#allocation18_spill]] %s1715_s0 }
   0x2   :  { %7 = vsyncpa [#allocation3], 0 }
   0x3   :  { %9 = vsyncpa [#allocation3 + $0x1], 0 }
   0x4   :  { %10 = vsyncpa [#allocation6], 0 }
   0x5   :  { %12 = vsyncpa [#allocation6 + $0x1], 0 }
   0x6   :  { %13 = vsyncpa [#allocation4], 0 }
   0x7   :  { %15 = vsyncpa [#allocation4 + $0x1], 0  ;;  %s1292_s9 = smov 0   ;;  %s1294_s10 = smov 0  }
   0x8   :  { %s1296_s11 = smov 0   ;;  %s1298_s12 = smov 0  }
   0x9   :  { %s1300_s13 = smov 0   ;;  %s1302_s14 = smov 0  }
   0xa   :  { %s1304_s15 = smov 0   ;;  %s1306_s16 = smov 0  }
   0xb   :  { %s1308_s17 = smov 0   ;;  %s1310_s18 = smov 0  }
   0xc   :  { %s1312_s19 = smov 0  }
   0xd LB: > { %1726 = sst [smem:[#allocation11_spill]] %s1232_s11  ;;  %s876_s20 = sadd.s32 4294967295, %s1264_s19   ;;  %s1264_s19 = sphi %s1312_s19, %s21_s19   ;;  %s1260_s18 = sphi %s1310_s18, %s1757_s18   ;;  %s1256_s17 = sphi %s1308_s17, %s1756_s17   ;;  %s1252_s16 = sphi %s1306_s16, %s1755_s16   ;;  %s1248_s15 = sphi %s1304_s15, %s1754_s15   ;;  %s1244_s14 = sphi %s1302_s14, %s1747_s14   ;;  %s1240_s13 = sphi %s1300_s13, %s1753_s13   ;;  %s1236_s12 = sphi %s1298_s12, %s1752_s12   ;;  %s1232_s11 = sphi %s1296_s11, %s1745_s11   ;;  %s1228_s10 = sphi %s1294_s10, %s1751_s10   ;;  %s1224_s9 = sphi %s1292_s9, %s1750_s9  }
   0xe   : > { %1727 = sst [smem:[#allocation12_spill]] %s1244_s14  ;;  %s877_s21 = sadd.s32 4294967294, %s1264_s19  }
   0xf   : > { %s30_s22 = sadd.s32 1, %s1256_s17  ;;  %s33_s23 = sadd.s32 1, %s1260_s18 }
  0x10   : > { %p31_p0 = scmp.ge.s32.totalorder %s30_s22, 2  ;;  %s42_s24 = sadd.s32 1, %s1244_s14 }
  0x11   : > { %p49_p1 = scmp.ne.s32.totalorder %s1244_s14, %s1240_s13  ;;  %p50_p2 = scmp.eq.s32.totalorder %s1264_s19, 0 }
  0x12   : > { %s1759_s22 = smov (%p31_p0, %s30_s22), 0  ;;  %s1761_s23 = smov (!%p31_p0, %s33_s23), %s1260_s18 }
  0x13   : > { %1728 = sst [smem:[#allocation13_spill]] %s1759_s22  ;;  %s37_s25 = ssub.s32 %s1256_s17, %s1759_s22 }
  0x14   : > { %p1358_p3 = por %p50_p2, %p49_p1  ;;  %p35_p4 = scmp.ge.s32.totalorder %s1761_s23, 2 }
  0x15   : > { %p55_p5 = scmp.ne.s32.totalorder %s1240_s13, %s1236_s12  ;;  %p56_p6 = scmp.eq.s32.totalorder %s876_s20, 0 }
  0x16   : > { %s96_s27 = sadd.s32 1, %s1232_s11  ;;  %s1763_s23 = smov (%p35_p4, %s1761_s23), 0 }
  0x17   : > { %1730 = sst [smem:[#allocation14_spill]] %s1763_s23  ;;  %p1366_p7 = por %p56_p6, %p55_p5 }
  0x18   : > { %p106_p8 = scmp.ne.s32.totalorder %s1232_s11, %s1228_s10  ;;  %s38_s29 = ssub.s32 %s1260_s18, %s1763_s23 }
  0x19   : > { %s1731_s28 = scalar_select %p1366_p7, 1, 0 }
  0x1a   : > { %p107_p9 = scmp.eq.s32.totalorder %s876_s20, 3  ;;  %s39_s30 = sor.u32 %s38_s29, %s37_s25 }
  0x1b   : > { %p94_p10 = scmp.eq.s32.totalorder %s38_s29, 0  ;;  %p40_p11 = scmp.eq.s32.totalorder %s39_s30, 0 }
  0x1c   : > { %p1374_p12 = por %p107_p9, %p106_p8  ;;  %p112_p13 = scmp.ne.s32.totalorder %s1228_s10, %s1224_s9 }
  0x1d   : > { %s1379_s4 = scalar_select %p94_p10, %s1232_s11, %s96_s27  }
  0x1e   : > { %s1732_s3 = scalar_select %p1374_p12, 1, 0 }
  0x1f   : > { %1733 = sst [smem:[#allocation15_spill]] %s1379_s4  ;;  %p113_p0 = scmp.eq.s32.totalorder %s877_s21, 3 }
  0x20   : > { %s1382_s5 = scalar_select %p40_p11, %s1244_s14, %s42_s24  }
  0x21   : > { %p970_p1 = scmp.lt.s32.totalorder %s1264_s19, 4  ;;  %p1387_p2 = por %p113_p0, %p112_p13 }
  0x22   : > { %1734 = sst [smem:[#allocation16_spill]] %s1382_s5  ;;  %s1392_s7 = sand.u32 1, %s1244_s14  }
  0x23   : > { %s1735_s6 = scalar_select %p1387_p2, 1, 0 }
  0x24   : > { %s880_s8 = sshll.u32 %s1392_s7, 5  ;;  %s881_s12 = sshll.u32 %s1256_s17, 3 }
  0x25   : > { %1736 = sst [smem:[#allocation17_spill]] %s1735_s6  ;;  %s142_s20 = sadd.s32 %s1260_s18, %s881_s12 }
  0x26   : > { %s137_s25 = scalar_lea.vmem [#allocation2], %s880_s8  ;;  %s882_s27 = sshll.u32 %s142_s20, 7 }
  0x27   : > { %s145_s29 = sshll.u32 %s137_s25, 4  ;;  %s1737_s0 = sld [smem:[#allocation18_spill]]  ;;  %s1397_s29 = int_to_ptr.vmem [resolvable:$true] %s145_s29 }
  0x28   : > { %p1406_p4 = pnand %p970_p1, %p1358_p3  ;;  %s134_s8 = scalar_lea.sflag [#allocation3], %s1392_s7 }
  0x2a   : > { %p1080_p6 = pneg %p1406_p4 }
  0x2d   : > { %s1402_s21 = scalar_lea.hbm %s1737_s0, %s882_s27  ;;  %s1083_s25 = scalar_lea.hbm %s1737_s0, 2048 }
  0x2e   : > { %s1078_s12 = scalar_lea.hbm %s1402_s21, 512  ;;  %p1084_p3 = scmp.lt.u32.totalorder %s1402_s21, %s1737_s0 }
  0x2f   : > { %p1079_p5 = scmp.ne.s32.totalorder %s1402_s21, %s1078_s12  ;;  %p1085_p10 = scmp.lt.u32.totalorder %s1083_s25, %s1078_s12 }
  0x30   : > { %p1087_p13 = scmp.lt.u32.totalorder %s1078_s12, %s1402_s21 }
  0x31   : > { %p1081_p8 = pnand %p1080_p6, %p1079_p5  ;;  %p1086_p11 = por %p1085_p10, %p1084_p3 }
  0x33   : > { %p1082_p9 = pneg %p1081_p8  ;;  %p1088_p0 = por %p1087_p13, %p1086_p11 }
  0x35   : > { %p1089_p1 = pnand %p1088_p0, %p1082_p9 }
  0x37   : > { %1092 = shalt.err (!%p1089_p1)
}
  0x38   : > { %s1093_s30 = scalar_lea.vmem %s1397_s29, 512  ;;  %s1266_s26 = smov [#allocation2]  }
  0x39   : > { %p1094_p5 = scmp.ne.s32.totalorder %s1397_s29, %s1093_s30  ;;  %s1098_s20 = sshll.u32 %s1266_s26, 4  ;;  %s1099_s20 = int_to_ptr.vmem [resolvable:$false] %s1098_s20 }
  0x3a   : > { %s1100_s27 = scalar_lea.vmem %s1099_s20, 1024  ;;  %p1101_p12 = scmp.lt.s32.totalorder %s1397_s29, %s1099_s20 }
  0x3b   : > { %p1096_p8 = pnand %p1094_p5, %p1080_p6  ;;  %p1102_p3 = scmp.lt.s32.totalorder %s1100_s27, %s1093_s30 }
  0x3d   : > { %p1097_p2 = pneg %p1096_p8  ;;  %p1103_p10 = por %p1102_p3, %p1101_p12 }
  0x3f   : > { %p1104_p11 = pnand %p1103_p10, %p1097_p2 }
  0x41   : > { %1107 = shalt.err (!%p1104_p11)
}
  0x42   : > { %s1267_s12 = smov 256   ;;  %s1268_s25 = smov 128  }
  0x43   : > { %s1269_s24 = smov 8   ;;  %p886_p12 = scmp.ge.s32.totalorder %s1264_s19, 1 }
  0x44   : > { %962 = dma.hbm_to_vmem [thread:$0]  (!%p1406_p4), %s1402_s21, 512, %s1397_s29, %s134_s8, %s1267_s12, %s1268_s25, %s1269_s24  }
  0x45   : > { %p173_p2 = scmp.lt.s32.totalorder %s1264_s19, 5  ;;  %s883_s30 = sshll.u32 %s1392_s7, 3 }
  0x46   : > { %s884_s20 = sshll.u32 %s1256_s17, 1  ;;  %s159_s27 = scalar_lea.vmem [#allocation5], %s883_s30 }
  0x47   : > { %p1441_p9 = pnand %p886_p12, %p173_p2  ;;  %s168_s0 = sshll.u32 %s159_s27, 4  ;;  %s1447_s0 = int_to_ptr.vmem [resolvable:$true] %s168_s0 }
  0x48   : > { %s164_s22 = sadd.s32 %s1260_s18, %s884_s20  ;;  %s156_s6 = scalar_lea.sflag [#allocation6], %s1392_s7 }
  0x49   : > { %s885_s5 = sshll.u32 %s164_s22, 7  ;;  %s1113_s12 = scalar_lea.hbm %s1716_s1, 512 }
  0x4a   : > { %s166_s11 = scalar_lea.hbm %s1716_s1, %s885_s5 }
  0x4b   : > { %s1108_s29 = scalar_lea.hbm %s166_s11, 128  ;;  %p1114_p5 = scmp.lt.u32.totalorder %s166_s11, %s1716_s1 }
  0x4c   : > { %p1109_p13 = scmp.ne.s32.totalorder %s166_s11, %s1108_s29  ;;  %p1115_p8 = scmp.lt.u32.totalorder %s1113_s12, %s1108_s29 }
  0x4d   : > { %p1117_p10 = scmp.lt.u32.totalorder %s1108_s29, %s166_s11 }
  0x4e   : > { %p1111_p0 = pnand %p1109_p13, %p1080_p6  ;;  %p1116_p3 = por %p1115_p8, %p1114_p5 }
  0x50   : > { %p1112_p1 = pneg %p1111_p0  ;;  %p1118_p11 = por %p1117_p10, %p1116_p3 }
  0x52   : > { %p1119_p12 = pnand %p1118_p11, %p1112_p1 }
  0x54   : > { %1122 = shalt.err (!%p1119_p12)
}
  0x55   : > { %s1123_s14 = scalar_lea.vmem %s1447_s0, 128  ;;  %s1270_s22 = smov [#allocation5]  }
  0x56   : > { %p1124_p2 = scmp.ne.s32.totalorder %s1447_s0, %s1123_s14  ;;  %s1128_s4 = sshll.u32 %s1270_s22, 4  ;;  %s1129_s4 = int_to_ptr.vmem [resolvable:$false] %s1128_s4 }
  0x57   : > { %s1130_s5 = scalar_lea.vmem %s1129_s4, 256  ;;  %p1131_p7 = scmp.lt.s32.totalorder %s1447_s0, %s1129_s4 }
  0x58   : > { %p1126_p13 = pnand %p1124_p2, %p1080_p6  ;;  %p1132_p5 = scmp.lt.s32.totalorder %s1130_s5, %s1123_s14 }
  0x5a   : > { %p1127_p0 = pneg %p1126_p13  ;;  %p1133_p8 = por %p1132_p5, %p1131_p7 }
  0x5c   : > { %p1134_p3 = pnand %p1133_p8, %p1127_p0 }
  0x5e   : > { %1137 = shalt.err (!%p1134_p3)
}
  0x5f   : > { %965 = dma.hbm_to_vmem [thread:$0]  (!%p1406_p4), %s166_s11, 128, %s1447_s0, %s156_s6  }
  0x60   : > { %177 = sbr.rel (%p1441_p9) target bundleno = 455 (0x1c7), region = 28  ;;  %s179_s7 = sand.u32 (!%p1441_p9), 1, %s1240_s13  }
  0x61   : > { %s887_s30 = sshll.u32 (!%p1441_p9), %s179_s7, 5  ;;  %s180_s20 = scalar_lea.sflag (!%p1441_p9), [#allocation3], %s179_s7 }
  0x62   : > { %s183_s27 = scalar_lea.vmem (!%p1441_p9), [#allocation2], %s887_s30  ;;  %p1740_p6 = scmp.ne.s32.totalorder (!%p1441_p9), %s1731_s28, 0 }
  0x67   : > { %1211 = dma.done.wait (%p1740_p6), %s180_s20, 512  }
  0x68   : > { %1213 = vsyncadd (%p1740_p6), %s180_s20, 4294966784  ;;  %s888_s29 = sshll.u32 %s179_s7, 3  ;;  %s189_s21 = scalar_lea.sflag [#allocation6], %s179_s7 }
  0x69   : > { %s1478_s23 = scalar_lea.vmem [#allocation5], %s888_s29 }
  0x6a   : > { %1215 = dma.done.wait (%p1740_p6), %s189_s21, 128  }
  0x6b   : > { %1217 = vsyncadd (%p1740_p6), %s189_s21, 4294967168  ;;  %s215_s0 = sand.u32 1, %s1228_s10   ;;  %p889_p7 = scmp.ne.s32.totalorder %s1248_s15, 0 }
  0x6c   : > { %s951_s11 = smul.u32 24, %s215_s0  ;;  %vm223_vm0 = vcmask (!%p889_p7), 27648   ;;  %v1271_v0 = vmov (!%p889_p7), 0.0  }
  0x6d   : > { %222 = sbr.rel (%p889_p7) target bundleno = 116 (0x74), region = 40 }
  0x6e   : > { %s1487_s6 = scalar_lea.vmem [#allocation7], %s951_s11 }
  0x6f   : > { %224 = vst.msk [vmem:[%s1487_s6] sm:$0xf] (!%p889_p7), %vm223_vm0, %v1271_v0  ;;  %225 = vst.msk [vmem:[%s1487_s6 + $0x4] sm:$0xf] (!%p889_p7), %vm223_vm0, %v1271_v0 }
  0x70   : > { %226 = vst.msk [vmem:[%s1487_s6 + $0x8] sm:$0xf] (!%p889_p7), %vm223_vm0, %v1271_v0  ;;  %227 = vst.msk [vmem:[%s1487_s6 + $0xc] sm:$0xf] (!%p889_p7), %vm223_vm0, %v1271_v0 }
  0x71   : > { %228 = vst.msk [vmem:[%s1487_s6 + $0x10] sm:$0xf] (!%p889_p7), %vm223_vm0, %v1271_v0  ;;  %229 = vst.msk [vmem:[%s1487_s6 + $0x14] sm:$0xf] (!%p889_p7), %vm223_vm0, %v1271_v0 }
  0x74 PF: > { %v282_v1 = vlaneseq  ;;  %v230_v2 = vld [vmem:[%s183_s27] sm:$0xff]  ;;  %v231_v3 = vld [vmem:[%s183_s27 + $0x8] sm:$0xff]  ;;  %v232_v4 = vld [vmem:[%s183_s27 + $0x10] sm:$0xff]  ;;  %vm234_vm1 = vcmask 130048   ;;  %v1272_v26 = vmov 0.0625|0.0625  }
  0x75   : > { %v233_v5 = vld [vmem:[%s183_s27 + $0x18] sm:$0xff]  ;;  %v235_v6 = vsel %vm234_vm1, %v230_v2, -inf  ;;  %v236_v7 = vsel %vm234_vm1, %v231_v3, -inf  ;;  %v237_v8 = vsel %vm234_vm1, %v232_v4, -inf  ;;  %v269_v41 = vld [vmem:[%s1478_s23] sm:$0xff]  ;;  %v1273_v47 = vmov 0.0  }
  0x76   : > { %v283_v9 = vshrl.u32 %v282_v1, 7  ;;  %v286_v10 = vand.u32 127, %v282_v1  ;;  %v238_v11 = vsel %vm234_vm1, %v233_v5, -inf  ;;  %v239_v12 = vmax.f32 %v235_v6, %v236_v7  ;;  %s952_s15 = smul.u32 384, %s1252_s16  ;;  %s765_s28 = sshll.u32 %s1487_s6, 4  ;;  %s1648_s28 = int_to_ptr.vmem [resolvable:$true] %s765_s28 }
  0x77   : > { %v240_v13 = vmax.f32 %v237_v8, %v238_v11  ;;  %vm270_vm9 = vcmp.eq.s32.totalorder %v269_v41, 0  ;;  %vm271_vm10 = vcmp.eq.s32.totalorder %v269_v41, 1  ;;  %vm272_vm11 = vcmp.eq.s32.totalorder %v269_v41, 2  ;;  %s1654_s12 = scalar_lea.sflag [#allocation4], %s215_s0  ;;  %s1138_s25 = scalar_lea.vmem %s1648_s28, 384 }
  0x78   : > { %v284_v14 = vadd.s32 8, %v283_v9  ;;  %v287_v15 = vmul.u32 4, %v286_v10  ;;  %v278_v48 = vsel %vm270_vm9, 1.0, %v1273_v47  ;;  %vm273_vm12 = vcmp.eq.s32.totalorder %v269_v41, 3  ;;  %s1646_s8 = scalar_lea.hbm %s1717_s2, %s952_s15  ;;  %p1139_p4 = scmp.ne.s32.totalorder %s1648_s28, %s1138_s25 }
  0x79   : > { %v241_v16 = vmax.f32 %v239_v12, %v240_v13  ;;  %v279_v52 = vsel %vm271_vm10, 1.0, %v1273_v47  ;;  %v280_v54 = vsel %vm272_vm11, 1.0, %v1273_v47  ;;  %v281_v55 = vsel %vm273_vm12, 1.0, %v1273_v47  ;;  %p1741_p9 = scmp.ne.s32.totalorder %s1732_s3, 0  ;;  %s1274_s24 = smov [#allocation7]  }
  0x7a   : > { %vm288_vm2 = vcmp.ge.s32.totalorder %v283_v9, %v287_v15  ;;  %vm289_vm3 = vcmp.ge.s32.totalorder %v284_v14, %v287_v15  ;;  %v290_v17 = vadd.s32 4, %v287_v15  ;;  %vm458_vm13 = vcmask 27648   ;;  %s1142_s14 = sshll.u32 %s1274_s24, 4  ;;  %s1143_s14 = int_to_ptr.vmem [resolvable:$false] %s1142_s14 }
  0x7b   : > { %v242_v18 = vsub.f32 %v230_v2, %v241_v16  ;;  %v243_v19 = vsub.f32 %v231_v3, %v241_v16  ;;  %v244_v20 = vsub.f32 %v232_v4, %v241_v16  ;;  %v245_v21 = vsub.f32 %v233_v5, %v241_v16  ;;  %p1140_p1 = pnand %p1139_p4, %p1741_p9  ;;  %s1144_s22 = scalar_lea.vmem %s1143_s14, 768 }
  0x7c   : > { %vm291_vm4 = vcmp.lt.s32.totalorder %v283_v9, %v290_v17  ;;  %vm292_vm5 = vcmp.lt.s32.totalorder %v284_v14, %v290_v17  ;;  %vm694_vm14 = vcmask 1041409   ;;  %vm697_vm15 = vcmask 1042434   ;;  %p1145_p11 = scmp.lt.s32.totalorder %s1648_s28, %s1143_s14  ;;  %p1146_p12 = scmp.lt.s32.totalorder %s1144_s22, %s1138_s25 }
  0x7d   : > { %vm293_vm6 = vmand %vm288_vm2, %vm291_vm4  ;;  %v246_v22 = vmul.f32 1.442695, %v242_v18  ;;  %v248_v23 = vmul.f32 1.442695, %v243_v19  ;;  %v250_v24 = vmul.f32 1.442695, %v244_v20  ;;  %p1141_p10 = pneg %p1140_p1 }
  0x7e   : > { %vm294_vm7 = vmand %vm289_vm3, %vm292_vm5  ;;  %v252_v25 = vmul.f32 1.442695, %v245_v21  ;;  %vm700_vm0 = vcmask 1043459   ;;  %p1147_p2 = por %p1146_p12, %p1145_p11 }
  0x7f   : > { %vm945_vm8 = vmpackc.low %vm294_vm7, %vm293_vm6  ;;  %1068 = vpow2.f32 %v246_v22 }
  0x80   : > { %949 = vmatprep.subr.msk.bf16.mxu1 %vm945_vm8, %v1272_v26  ;;  %946 = vmatprep.subr.msk.bf16.mxu0 %vm945_vm8, %v1272_v26  ;;  %1070 = vpow2.f32 %v248_v23  ;;  %p1148_p13 = pnand %p1147_p2, %p1141_p10 }
  0x81   : > { %950 = vmatpush3.bf16.msk.msra.mxu1 %vm945_vm8, %v1272_v26  ;;  %948 = vmatpush3.bf16.msk.msra.mxu0 %vm945_vm8, %v1272_v26  ;;  %1072 = vpow2.f32 %v250_v24 }
  0x82   : > { %1074 = vpow2.f32 %v252_v25 }
  0x89   : > { %v1069_v27 = vpop.eup %1068 }
  0x8a   : > { %v1071_v28 = vpop.eup %1070  ;;  %v254_v29 = vsel %vm234_vm1, %v1069_v27, 0.0 }
  0x8b   : > { %v1073_v30 = vpop.eup %1072  ;;  %v255_v31 = vsel %vm234_vm1, %v1071_v28, 0.0 }
  0x8c   : > { %v1075_v32 = vpop.eup %1074  ;;  %v256_v33 = vadd.f32 %v255_v31, %v254_v29  ;;  %v257_v34 = vsel %vm234_vm1, %v1073_v30, 0.0 }
  0x8d   : > { %v259_v35 = vsel %vm234_vm1, %v1075_v32, 0.0 }
  0x8e   : > { %v258_v36 = vadd.f32 %v257_v34, %v256_v33 }
  0x90   : > { %v260_v37 = vadd.f32 %v259_v35, %v258_v36 }
  0x92   : > { %1076 = vrcp.f32 %v260_v37 }
  0x9c   : > { %v1077_v38 = vpop.eup %1076 }
  0x9d   : > { %v262_v39 = vmul.f32 %v1077_v38, %v260_v37 }
  0x9f   : > { %v263_v40 = vsub.f32 2.0, %v262_v39 }
  0xa1   : > { %v264_v42 = vmul.f32 %v1077_v38, %v263_v40 }
  0xa3   : > { %v267_v43 = vmul.f32 %v1073_v30, %v264_v42  ;;  %v265_v44 = vmul.f32 %v1069_v27, %v264_v42  ;;  %v268_v45 = vmul.f32 %v1075_v32, %v264_v42  ;;  %v266_v46 = vmul.f32 %v1071_v28, %v264_v42 }
  0xa5   : > { %936 = vmatprep.mubr.msk.f32.mxu1 %vm234_vm1, %v267_v43  ;;  %v274_v49 = vsel %vm270_vm9, %v265_v44, 0.0  ;;  %v275_v50 = vsel %vm271_vm10, %v266_v46, 0.0  ;;  %v276_v51 = vsel %vm272_vm11, %v267_v43, 0.0  ;;  %v277_v53 = vsel %vm273_vm12, %v268_v45, 0.0 }
  0xa6   : > { %927 = vmatprep.mubr.msk.f32.mxu0 %vm234_vm1, %v274_v49  ;;  %937 = vmatmul.mubr.msk.f32.vlgmr.msra.gmra.mrb[0].mxu1 %vm234_vm1, %v268_v45 }
  0xa7   : > { %928 = vmatmul.mubr.msk.f32.vlgmr.msra.gmra.mrb[0].mxu0 %vm234_vm1, %v275_v50  ;;  %939 = vmatprep.mubr.msk.f32.mxu1 %vm234_vm1, %v278_v48 }
  0xa8   : > { %930 = vmatprep.mubr.msk.f32.mxu0 %vm234_vm1, %v276_v51 }
  0xaa   : > { %940 = vmatmul.mubr.msk.f32.gmra.mrb[2].mxu1 %vm234_vm1, %v279_v52 }
  0xab   : > { %931 = vmatmul.mubr.msk.f32.gmra.mrb[2].mxu0 %vm234_vm1, %v277_v53  ;;  %942 = vmatprep.mubr.msk.f32.mxu1 %vm234_vm1, %v280_v54 }
  0xac   : > { %933 = vmatprep.mubr.msk.f32.mxu0 %vm234_vm1, %v265_v44 }
  0xae   : > { %943 = vmatmul.mubr.msk.f32.gmra.mrb[4].mxu1 %vm234_vm1, %v281_v55 }
  0xaf   : > { %934 = vmatmul.mubr.msk.f32.gmra.mrb[4].mxu0 %vm234_vm1, %v266_v46 }
 0x179   : > { %v938_v56 = vpop.f32.mrb[0].mxu1 }
 0x17a   : > { %v508_v57 = vsel %vm458_vm13, %v938_v56, 0.0  ;;  %v929_v58 = vpop.f32.mrb[0].mxu0  ;;  %v429_v59 = vpop.f32.mrb[1].mxu1  ;;  %v562_v60 = vrot.slane %v938_v56, 4 }
 0x17b   : > { %v466_v61 = vsel %vm458_vm13, %v929_v58, 0.0  ;;  %v556_v62 = vrot.slane %v929_v58, 4  ;;  %v399_v63 = vpop.f32.mrb[1].mxu0  ;;  %v509_v1 = vrot.slane %v508_v57, 4  ;;  %v501_v7 = vsel %vm458_vm13, %v429_v59, 0.0 }
 0x17c   : > { %v467_v0 = vrot.slane %v466_v61, 4  ;;  %v459_v3 = vsel %vm458_vm13, %v399_v63, 0.0  ;;  %v628_v10 = vsel %vm458_vm13, %v562_v60, 0.0  ;;  %v555_v15 = vrot.slane %v399_v63, 4 }
 0x17d   : > { %v586_v2 = vsel %vm458_vm13, %v556_v62, 0.0  ;;  %v941_v4 = vpop.f32.mrb[2].mxu1  ;;  %v460_v11 = vrot.slane %v459_v3, 4  ;;  %v510_v16 = vadd.f32 %v509_v1, %v508_v57  ;;  %v502_v17 = vrot.slane %v501_v7, 4 }
 0x17e   : > { %v468_v5 = vadd.f32 %v467_v0, %v466_v61  ;;  %v587_v6 = vrot.slane %v586_v2, 4  ;;  %v932_v8 = vpop.f32.mrb[2].mxu0  ;;  %v1526_v9 = vpop.f32.mrb[3].mxu1  ;;  %v561_v18 = vrot.slane %v429_v59, 4  ;;  %v629_v21 = vrot.slane %v628_v10, 4 }
 0x17f   : > { %v1529_v12 = vpop.f32.mrb[3].mxu0  ;;  %v461_v19 = vadd.f32 %v460_v11, %v459_v3  ;;  %v579_v24 = vsel %vm458_vm13, %v555_v15, 0.0  ;;  %v511_v32 = vrot.slane %v510_v16, 2  ;;  %v1540_v33 = vadd.f32 %v502_v17, %v501_v7 }
 0x180   : > { %v469_v13 = vrot.slane %v468_v5, 2  ;;  %v588_v14 = vadd.f32 %v587_v6, %v586_v2  ;;  %v580_v31 = vrot.slane %v579_v24, 4  ;;  %v1543_v34 = vsel %vm458_vm13, %v561_v18, 0.0 }
 0x181   : > { %v1531_v20 = vpop.f32.mrb[4].mxu1  ;;  %v462_v27 = vrot.slane %v461_v19, 2  ;;  %v1545_v36 = vadd.f32 %v629_v21, %v628_v10  ;;  %v622_v43 = vrot.slane %v1543_v34, 4  ;;  %v1548_v45 = vadd.f32 %v511_v32, %v510_v16 }
 0x182   : > { %v470_v22 = vadd.f32 %v469_v13, %v468_v5  ;;  %v589_v23 = vrot.slane %v588_v14, 2  ;;  %v1534_v25 = vpop.f32.mrb[4].mxu0  ;;  %v1536_v26 = vpop.f32.mrb[5].mxu1  ;;  %v581_v39 = vadd.f32 %v580_v31, %v579_v24  ;;  %v504_v46 = vrot.slane %v1540_v33, 2 }
 0x183   : > { %v1538_v28 = vpop.f32.mrb[5].mxu0  ;;  %v463_v35 = vadd.f32 %v462_v27, %v461_v19  ;;  %v522_v48 = vsel %vm458_vm13, %v941_v4, 0.0  ;;  %v631_v49 = vrot.slane %v1545_v36, 2  ;;  %v564_v52 = vrot.slane %v941_v4, 4 }
 0x184   : > { %v471_v29 = vrot.slane %v470_v22, 1  ;;  %v590_v30 = vadd.f32 %v589_v23, %v588_v14  ;;  %v582_v44 = vrot.slane %v581_v39, 2  ;;  %v523_v51 = vrot.slane %v522_v48, 4 }
 0x185   : > { %v464_v40 = vrot.slane %v463_v35, 1  ;;  %v480_v55 = vsel %vm458_vm13, %v932_v8, 0.0  ;;  %v558_v56 = vrot.slane %v932_v8, 4  ;;  %v642_v59 = vsel %vm458_vm13, %v564_v52, 0.0 }
 0x186   : > { %v472_v37 = vadd.f32 %v471_v29, %v470_v22  ;;  %v591_v38 = vrot.slane %v590_v30, 1  ;;  %v583_v50 = vadd.f32 %v582_v44, %v581_v39  ;;  %v524_v58 = vadd.f32 %v523_v51, %v522_v48 }
 0x187   : > { %v465_v47 = vadd.f32 %v464_v40, %v463_v35  ;;  %v481_v60 = vrot.slane %v480_v55, 4  ;;  %v643_v61 = vrot.slane %v642_v59, 4  ;;  %v600_v62 = vsel %vm458_vm13, %v558_v56, 0.0 }
 0x188   : > { %v592_v41 = vadd.f32 %v591_v38, %v590_v30  ;;  %v693_v42 = vrot.slane %v472_v37, 7  ;;  %v584_v57 = vrot.slane %v583_v50, 1  ;;  %v515_v63 = vsel %vm458_vm13, %v1526_v9, 0.0 }
 0x189   : > { %v563_v0 = vrot.slane %v1526_v9, 4  ;;  %v525_v2 = vrot.slane %v524_v58, 2  ;;  %v482_v3 = vadd.f32 %v481_v60, %v480_v55  ;;  %v601_v4 = vrot.slane %v600_v62, 4 }
 0x18a   : > { %v714_v53 = vrot.slane %v592_v41, 7  ;;  %v1554_v54 = vsel %vm694_vm14, %v693_v42, %v465_v47  ;;  %v585_v1 = vadd.f32 %v584_v57, %v583_v50  ;;  %v644_v5 = vadd.f32 %v643_v61, %v642_v59 }
 0x18b   : > { %v516_v6 = vrot.slane %v515_v63, 4  ;;  %v635_v7 = vsel %vm458_vm13, %v563_v0, 0.0  ;;  %v473_v8 = vsel %vm458_vm13, %v1529_v12, 0.0  ;;  %v526_v11 = vadd.f32 %v525_v2, %v524_v58 }
 0x18c   : > { %v1566_v10 = vsel %vm694_vm14, %v714_v53, %v585_v1  ;;  %v483_v13 = vrot.slane %v482_v3, 2  ;;  %v602_v14 = vadd.f32 %v601_v4, %v600_v62  ;;  %v645_v15 = vrot.slane %v644_v5, 2 }
 0x18d   : > { %v517_v16 = vadd.f32 %v516_v6, %v515_v63  ;;  %v636_v9 = vrot.slane %v635_v7, 4  ;;  %v474_v17 = vrot.slane %v473_v8, 4  ;;  %v527_v18 = vrot.slane %v526_v11, 1 }
 0x18e   : > { %v484_v19 = vadd.f32 %v483_v13, %v482_v3  ;;  %v603_v21 = vrot.slane %v602_v14, 2  ;;  %v557_v22 = vrot.slane %v1529_v12, 4  ;;  %v646_v23 = vadd.f32 %v645_v15, %v644_v5 }
 0x18f   : > { %v518_v24 = vrot.slane %v517_v16, 2  ;;  %v637_v27 = vadd.f32 %v636_v9, %v635_v7  ;;  %v475_v29 = vadd.f32 %v474_v17, %v473_v8  ;;  %v528_v30 = vadd.f32 %v527_v18, %v526_v11 }
 0x190   : > { %v485_v31 = vrot.slane %v484_v19, 1  ;;  %v604_v32 = vadd.f32 %v603_v21, %v602_v14  ;;  %v593_v35 = vsel %vm458_vm13, %v557_v22, 0.0  ;;  %v647_v37 = vrot.slane %v646_v23, 1  ;;  %v663_v14 = vld [vmem:[%s1487_s6] sm:$0xf] }
 0x191   : > { %v519_v38 = vadd.f32 %v518_v24, %v517_v16  ;;  %v638_v39 = vrot.slane %v637_v27, 2  ;;  %v476_v40 = vrot.slane %v475_v29, 2  ;;  %v708_v41 = vrot.slane %v528_v30, 7 }
 0x192   : > { %v486_v42 = vadd.f32 %v485_v31, %v484_v19  ;;  %v605_v44 = vrot.slane %v604_v32, 1  ;;  %v594_v47 = vrot.slane %v593_v35, 4  ;;  %v648_v12 = vadd.f32 %v647_v37, %v646_v23 }
 0x193   : > { %v520_v48 = vrot.slane %v519_v38, 1  ;;  %v639_v50 = vadd.f32 %v638_v39, %v637_v27  ;;  %v477_v51 = vadd.f32 %v476_v40, %v475_v29  ;;  %v1573_v52 = vadd.f32 %v622_v43, %v1543_v34  ;;  %v666_v40 = vld [vmem:[%s1487_s6 + $0xc] sm:$0xf] }
 0x194   : > { %v606_v53 = vadd.f32 %v605_v44, %v604_v32  ;;  %v595_v55 = vadd.f32 %v594_v47, %v593_v35  ;;  %v536_v56 = vsel %vm458_vm13, %v1531_v20, 0.0  ;;  %v726_v57 = vrot.slane %v648_v12, 7 }
 0x195   : > { %v521_v58 = vadd.f32 %v520_v48, %v519_v38  ;;  %v640_v59 = vrot.slane %v639_v50, 1  ;;  %v478_v60 = vrot.slane %v477_v51, 1  ;;  %v699_v61 = vrot.slane %v486_v42, 5 }
 0x196   : > { %v596_v62 = vrot.slane %v595_v55, 2  ;;  %v537_v63 = vrot.slane %v536_v56, 4  ;;  %v566_v0 = vrot.slane %v1531_v20, 4  ;;  %v494_v43 = vsel %vm458_vm13, %v1534_v25, 0.0 }
 0x197   : > { %v641_v1 = vadd.f32 %v640_v59, %v639_v50  ;;  %v1579_v2 = vsel %vm694_vm14, %v708_v41, %v521_v58  ;;  %v479_v34 = vadd.f32 %v478_v60, %v477_v51  ;;  %v495_v6 = vrot.slane %v494_v43, 4 }
 0x198   : > { %v597_v3 = vadd.f32 %v596_v62, %v595_v55  ;;  %v538_v4 = vadd.f32 %v537_v63, %v536_v56  ;;  %v656_v5 = vsel %vm458_vm13, %v566_v0, 0.0  ;;  %v560_v20 = vrot.slane %v1534_v25, 4 }
 0x199   : > { %v1585_v7 = vsel %vm694_vm14, %v726_v57, %v641_v1  ;;  %v696_v8 = vrot.slane %v479_v34, 6  ;;  %v657_v11 = vrot.slane %v656_v5, 4  ;;  %v496_v16 = vadd.f32 %v495_v6, %v494_v43 }
 0x19a   : > { %v598_v13 = vrot.slane %v597_v3, 1  ;;  %v539_v15 = vrot.slane %v538_v4, 2  ;;  %v529_v9 = vsel %vm458_vm13, %v1536_v26, 0.0  ;;  %v614_v19 = vsel %vm458_vm13, %v560_v20, 0.0 }
 0x19b   : > { %v698_v17 = vsel %vm697_vm15, %v696_v8, %v1554_v54  ;;  %v658_v18 = vadd.f32 %v657_v11, %v656_v5  ;;  %v530_v21 = vrot.slane %v529_v9, 4  ;;  %v497_v24 = vrot.slane %v496_v16, 2 }
 0x19c   : > { %v599_v22 = vadd.f32 %v598_v13, %v597_v3  ;;  %v701_v23 = vsel %vm700_vm0, %v699_v61, %v698_v17  ;;  %v540_v25 = vadd.f32 %v539_v15, %v538_v4  ;;  %v505_v27 = vadd.f32 %v504_v46, %v1540_v33 }
 0x19d   : > { %v738_v29 = vadd.f32 %v701_v23, %v663_v14  ;;  %v615_v30 = vrot.slane %v614_v19, 4  ;;  %v531_v31 = vadd.f32 %v530_v21, %v529_v9  ;;  %v659_v54 = vrot.slane %v658_v18, 2 }
 0x19e   : > { %v716_v32 = vrot.slane %v599_v22, 6  ;;  %v498_v35 = vadd.f32 %v497_v24, %v496_v16  ;;  %v565_v37 = vrot.slane %v1536_v26, 4  ;;  %v513_v38 = vrot.slane %v1548_v45, 1 }
 0x19f   : > { %v718_v39 = vrot.slane %v606_v53, 5  ;;  %744 = vst.msk [vmem:[%s1487_s6] sm:$0xf] %vm458_vm13, %v738_v29  ;;  %v616_v41 = vadd.f32 %v615_v30, %v614_v19  ;;  %v532_v42 = vrot.slane %v531_v31, 2  ;;  %v541_v33 = vrot.slane %v540_v25, 1 }
 0x1a0   : > { %v717_v44 = vsel %vm697_vm15, %v716_v32, %v1566_v10  ;;  %v649_v46 = vsel %vm458_vm13, %v565_v37, 0.0  ;;  %v487_v47 = vsel %vm458_vm13, %v1538_v28, 0.0  ;;  %v624_v26 = vrot.slane %v1573_v52, 2 }
 0x1a1   : > { %v719_v12 = vsel %vm700_vm0, %v718_v39, %v717_v44  ;;  %v617_v48 = vrot.slane %v616_v41, 2  ;;  %v533_v50 = vadd.f32 %v532_v42, %v531_v31  ;;  %v660_v53 = vadd.f32 %v659_v54, %v658_v18 }
 0x1a2   : > { %v741_v51 = vadd.f32 %v719_v12, %v666_v40  ;;  %v499_v55 = vrot.slane %v498_v35, 1  ;;  %v650_v56 = vrot.slane %v649_v46, 4  ;;  %v632_v10 = vadd.f32 %v631_v49, %v1545_v36 }
 0x1a3   : > { %v618_v57 = vadd.f32 %v617_v48, %v616_v41  ;;  %v534_v58 = vrot.slane %v533_v50, 1  ;;  %v488_v59 = vrot.slane %v487_v47, 4  ;;  %v506_v60 = vrot.slane %v505_v27, 1  ;;  %v664_v41 = vld [vmem:[%s1487_s6 + $0x4] sm:$0xf] }
 0x1a4   : > { %747 = vst.msk [vmem:[%s1487_s6 + $0xc] sm:$0xf] %vm458_vm13, %v741_v51  ;;  %v542_v61 = vadd.f32 %v541_v33, %v540_v25  ;;  %v651_v62 = vadd.f32 %v650_v56, %v649_v46  ;;  %v559_v63 = vrot.slane %v1538_v28, 4  ;;  %v514_v0 = vadd.f32 %v513_v38, %v1548_v45  ;;  %v665_v45 = vld [vmem:[%s1487_s6 + $0x8] sm:$0xf] }
 0x1a5   : > { %v625_v1 = vadd.f32 %v624_v26, %v1573_v52  ;;  %v535_v34 = vadd.f32 %v534_v58, %v533_v50  ;;  %v489_v43 = vadd.f32 %v488_v59, %v487_v47  ;;  %v661_v3 = vrot.slane %v660_v53, 1 }
 0x1a6   : > { %v500_v4 = vadd.f32 %v499_v55, %v498_v35  ;;  %v652_v36 = vrot.slane %v651_v62, 2  ;;  %v607_v49 = vsel %vm458_vm13, %v559_v63, 0.0  ;;  %v619_v5 = vrot.slane %v618_v57, 1  ;;  %v668_v35 = vld [vmem:[%s1487_s6 + $0x14] sm:$0xf] }
 0x1a7   : > { %v710_v6 = vrot.slane %v535_v34, 6  ;;  %v490_v8 = vrot.slane %v489_v43, 2  ;;  %v608_v11 = vrot.slane %v607_v49, 4  ;;  %v633_v20 = vrot.slane %v632_v10, 1 }
 0x1a8   : > { %v507_v13 = vadd.f32 %v506_v60, %v505_v27  ;;  %v712_v14 = vrot.slane %v542_v61, 5  ;;  %v653_v28 = vadd.f32 %v652_v36, %v651_v62  ;;  %v626_v15 = vrot.slane %v625_v1, 1 }
 0x1a9   : > { %v711_v52 = vsel %vm697_vm15, %v710_v6, %v1579_v2  ;;  %v491_v16 = vadd.f32 %v490_v8, %v489_v43  ;;  %v609_v9 = vadd.f32 %v608_v11, %v607_v49  ;;  %v662_v17 = vadd.f32 %v661_v3, %v660_v53  ;;  %v667_v53 = vld [vmem:[%s1487_s6 + $0x10] sm:$0xf] }
 0x1aa   : > { %v702_v18 = vrot.slane %v500_v4, 7  ;;  %v654_v19 = vrot.slane %v653_v28, 1  ;;  %v713_v21 = vsel %vm700_vm0, %v712_v14, %v711_v52  ;;  %v620_v22 = vadd.f32 %v619_v5, %v618_v57 }
 0x1ab   : > { %v740_v23 = vadd.f32 %v713_v21, %v665_v45  ;;  %v492_v25 = vrot.slane %v491_v16, 1  ;;  %v610_v24 = vrot.slane %v609_v9, 2  ;;  %v634_v29 = vadd.f32 %v633_v20, %v632_v10 }
 0x1ac   : > { %v655_v27 = vadd.f32 %v654_v19, %v653_v28  ;;  %v706_v2 = vrot.slane %v514_v0, 5  ;;  %v627_v32 = vadd.f32 %v626_v15, %v625_v1  ;;  %v704_v54 = vrot.slane %v507_v13, 6 }
 0x1ad   : > { %746 = vst.msk [vmem:[%s1487_s6 + $0x8] sm:$0xf] %vm458_vm13, %v740_v23  ;;  %v493_v30 = vadd.f32 %v492_v25, %v491_v16  ;;  %v611_v31 = vadd.f32 %v610_v24, %v609_v9  ;;  %v730_v38 = vrot.slane %v662_v17, 5  ;;  %v720_v39 = vrot.slane %v620_v22, 7 }
 0x1ae   : > { %v728_v37 = vrot.slane %v655_v27, 6  ;;  %v722_v12 = vrot.slane %v627_v32, 6  ;;  %v724_v51 = vrot.slane %v634_v29, 5 }
 0x1af   : > { %v612_v40 = vrot.slane %v611_v31, 1  ;;  %v703_v42 = vsel %vm694_vm14, %v702_v18, %v493_v30 }
 0x1b0   : > { %v729_v44 = vsel %vm697_vm15, %v728_v37, %v1585_v7  ;;  %v705_v33 = vsel %vm697_vm15, %v704_v54, %v703_v42 }
 0x1b1   : > { %v731_v46 = vsel %vm700_vm0, %v730_v38, %v729_v44  ;;  %v613_v47 = vadd.f32 %v612_v40, %v611_v31  ;;  %v707_v26 = vsel %vm700_vm0, %v706_v2, %v705_v33 }
 0x1b2   : > { %v743_v48 = vadd.f32 %v731_v46, %v668_v35  ;;  %v739_v50 = vadd.f32 %v707_v26, %v664_v41 }
 0x1b3   : > { %v721_v55 = vsel %vm694_vm14, %v720_v39, %v613_v47 }
 0x1b4   : > { %749 = vst.msk [vmem:[%s1487_s6 + $0x14] sm:$0xf] %vm458_vm13, %v743_v48  ;;  %v723_v7 = vsel %vm697_vm15, %v722_v12, %v721_v55  ;;  %745 = vst.msk [vmem:[%s1487_s6 + $0x4] sm:$0xf] %vm458_vm13, %v739_v50 }
 0x1b5   : > { %v725_v56 = vsel %vm700_vm0, %v724_v51, %v723_v7 }
 0x1b6   : > { %v742_v10 = vadd.f32 %v725_v56, %v667_v53 }
 0x1b8   : > { %748 = vst.msk [vmem:[%s1487_s6 + $0x10] sm:$0xf] %vm458_vm13, %v742_v10 }
 0x1b9   : > { %1151 = shalt.err (!%p1148_p13)
}
 0x1ba   : > { %s1152_s4 = scalar_lea.hbm %s1646_s8, 384  ;;  %s1156_s30 = scalar_lea.hbm %s1717_s2, 768 }
 0x1bb   : > { %p1153_p0 = scmp.ne.s32.totalorder %s1646_s8, %s1152_s4  ;;  %p1157_p3 = scmp.lt.u32.totalorder %s1646_s8, %s1717_s2 }
 0x1bc   : > { %p1158_p6 = scmp.lt.u32.totalorder %s1156_s30, %s1152_s4  ;;  %p1160_p4 = scmp.lt.u32.totalorder %s1152_s4, %s1646_s8 }
 0x1bd   : > { %p1154_p5 = pnand %p1153_p0, %p1741_p9 }
 0x1be   : > { %p1159_p7 = por %p1158_p6, %p1157_p3 }
 0x1bf   : > { %p1155_p8 = pneg %p1154_p5 }
 0x1c0   : > { %p1161_p1 = por %p1160_p4, %p1159_p7 }
 0x1c2   : > { %p1162_p10 = pnand %p1161_p1, %p1155_p8 }
 0x1c4   : > { %1165 = shalt.err (!%p1162_p10)
}
 0x1c5   : > { %s1275_s29 = smov 64   ;;  %s1276_s21 = smov 4  }
 0x1c6   : > { %957 = dma.vmem_to_hbm [thread:$0]  (%p1741_p9), %s1648_s28, 384, %s1646_s8, %s1654_s12, %s1275_s29, %s1275_s29, %s1276_s21  }
 0x1c7 PF: > { %s1742_s23 = sld [smem:[#allocation17_spill]]  ;;  %p971_p11 = scmp.ge.s32.totalorder %s1264_s19, 2 }
 0x1c8   : > { %s780_s0 = sand.u32 1, %s1224_s9  }
 0x1c9   : > { %s781_s11 = scalar_lea.sflag [#allocation4], %s780_s0 }
 0x1cd   : > { %p1743_p12 = scmp.ne.s32.totalorder %s1742_s23, 0 }
 0x1cf   : > { %p967_p2 = pnand %p971_p11, %p1743_p12 }
 0x1d1   : > { %1219 = dma.done.wait (!%p967_p2), %s781_s11, 384  }
 0x1d2   : > { %1221 = vsyncadd (!%p967_p2), %s781_s11, 4294966912  ;;  %s21_s19 = sadd.s32 1, %s1264_s19   ;;  %s1744_s6 = sld [smem:[#allocation11_spill]] }
 0x1d3   : > { %p18_p13 = scmp.ge.s32.totalorder %s21_s19, 6   ;;  %s1745_s11 = sld [smem:[#allocation15_spill]] }
 0x1d4   : > { %s1746_s3 = sld [smem:[#allocation12_spill]]  ;;  %s1747_s14 = sld [smem:[#allocation16_spill]] }
 0x1d5   : > { %s1748_s28 = sld [smem:[#allocation13_spill]]  ;;  %s1749_s26 = sld [smem:[#allocation14_spill]] }
 0x1d6   : > { %s1750_s9 = smov %s1228_s10  ;;  %s1752_s12 = smov %s1240_s13 }
 0x1d7   : > { %s1754_s15 = smov %s1256_s17  ;;  %s1755_s16 = smov %s1260_s18 }
 0x1d8   : > { %s1751_s10 = smov %s1744_s6  ;;  %20 = sbr.rel (!%p18_p13) target bundleno = 13 (0xd), region = 90 }
 0x1da   : > { %s1753_s13 = smov %s1746_s3 }
 0x1db   : > { %s1756_s17 = smov %s1748_s28  ;;  %s1757_s18 = smov %s1749_s26 }
 0x1df   :  { %786 = vsyncpa [#allocation3], 1 }
 0x1e0   :  { %788 = vsyncpa [#allocation3 + $0x1], 1 }
 0x1e1   :  { %789 = vsyncpa [#allocation6], 1 }
 0x1e2   :  { %791 = vsyncpa [#allocation6 + $0x1], 1 }
 0x1e3   :  { %792 = vsyncpa [#allocation4], 1 }
 0x1e4   :  { %794 = vsyncpa [#allocation4 + $0x1], 1 }

</bundles_post_ra>
